<compile_context>
chip_gen: v6e
topology: v6e:2x2x1
jax: 0.10.0
libtpu: 0.0.40
codegen_flags: <defaults>
</compile_context>

<pallas_src>
import jax
import jax.numpy as jnp
from jax import lax
from jax.experimental import pallas as pl
from jax.experimental.pallas import tpu as pltpu


def _attention_kernel(lens_ref, dec_ref, enc_ref, ctx_ref, w_ref):
    """Fused scores -> mask -> softmax -> context for one batch tile.

    lens_ref : SMEM (B,) int32         (scalar-prefetched, full array)
    dec_ref  : VMEM (S_dec, b_tile, H) seq-first decoder tile
    enc_ref  : VMEM (S_enc, b_tile, H) seq-first encoder tile
    ctx_ref  : VMEM (b_tile, S_dec, H)
    w_ref    : VMEM (b_tile, S_dec, S_enc)
    """
    s_dec, b_tile, _ = dec_ref.shape
    s_enc = enc_ref.shape[0]
    n_batch = lens_ref.shape[0]
    b0 = pl.program_id(0) * b_tile

    # Key-position iota, hoisted out of the per-element loop (broadcasts are
    # not CSE'd by JAX).
    k_idx = lax.broadcasted_iota(jnp.int32, (s_dec, s_enc), 1)

    # bf16 MXU operands for the value-side matmul when inputs are f32; if the
    # caller already feeds <=16-bit activations, use them as-is everywhere.
    mxu_dtype = jnp.bfloat16 if dec_ref.dtype == jnp.float32 else dec_ref.dtype

    # Static unroll over the batch tile: one small 2-D matmul pair per element.
    # (For the ragged last tile the padded elements compute on unspecified data;
    # Pallas discards those output rows, and the lens index is clamped so the
    # SMEM read stays in bounds.)
    for i in range(b_tile):
        len_i = lens_ref[jnp.minimum(b0 + i, n_batch - 1)]

        dec_i = dec_ref[:, i, :]          # (S_dec, H)  -- read straight from the
        enc_i = enc_ref[:, i, :]          # (S_enc, H)     seq-first tile, no copy pass

        # scores[q, k] = dec_i[q, :] . enc_i[k, :]   ("NT" MXU matmul, f32 acc).
        # Kept in the input dtype: exp() amplifies logit error into weight error.
        scores = lax.dot_general(
            dec_i, enc_i,
            dimension_numbers=(((1,), (1,)), ((), ())),
            preferred_element_type=jnp.float32)          # (S_dec, S_enc)

        # Sequence mask: keep key position k iff k < lens[b].
        # (lens[b] == 0 yields a NaN row, matching PyTorch on fully-masked rows.)
        scores = jnp.where(k_idx < len_i, scores, -jnp.inf)

        # f32 softmax with exact normalization (rows sum to 1, torch parity).
        m = jnp.max(scores, axis=-1, keepdims=True)
        e = jnp.exp(scores - m)
        w = e / jnp.sum(e, axis=-1, keepdims=True)

        w_ref[i] = w.astype(w_ref.dtype)

        # context[q, :] = sum_k w[q, k] * enc_i[k, :]  (bf16 operands, f32 acc).
        ctx = lax.dot_general(
            w.astype(mxu_dtype), enc_i.astype(mxu_dtype),
            dimension_numbers=(((1,), (0,)), ((), ())),
            preferred_element_type=jnp.float32)          # (S_dec, H)
        ctx_ref[i] = ctx.astype(ctx_ref.dtype)


def _vmem_capacity_bytes():
    """Chip VMEM capacity; conservative (v7x-sized) fallback if unqueryable."""
    try:
        return int(pltpu.get_tpu_info().vmem_capacity_bytes)
    except Exception:
        return 64 * 1024 * 1024


def _choose_batch_tile(B, S_dec, S_enc, H, vmem_budget_bytes, max_unroll=32):
    """Pick the batch-tile size.

    Constraints / goals:
      * (8,128) layout rule: with the batch dim second-to-last in the input
        blocks, b_tile must be a multiple of 8 or equal to B.
      * Full VMEM accounting: 2x (double-buffered) input+output tile bytes plus
        one element's in-kernel temporaries must fit the requested budget.
      * ~8 grid steps (>= 2 whenever B allows) so DMA and compute overlap and
        v7x's two TensorCores both get work on the "parallel" axis.
      * Cap the static per-element unroll.
    """
    per_b_io = 4 * (2 * S_dec * H + S_enc * H + S_dec * S_enc)       # dec+ctx, enc, weights
    temps = 4 * (4 * S_dec * S_enc + 3 * S_dec * H + 3 * S_enc * H)  # one element's live set
    usable = int(0.8 * vmem_budget_bytes) - temps
    fit = max(1, usable // (2 * per_b_io))

    if B <= 8:
        # Cannot split below 8 along the sublane dim without padding; a single
        # full-batch tile is the only layout-legal choice (trivial work anyway).
        return B

    bt = min(fit, max_unroll, max(1, pl.cdiv(B, 8)))   # aim for ~8 grid steps
    bt = max(8, (bt // 8) * 8)                         # multiple of 8 (layout rule)
    return min(bt, B)


def attention_forward(encoder_outputs, decoder_output, lens):
    """encoder_outputs: (S_enc, B, H), decoder_output: (S_dec, B, H), lens: (B,).

    Returns (context_vector (B, S_dec, H), attention_weights (B, S_dec, S_enc)).
    """
    S_enc, B, H = encoder_outputs.shape
    S_dec = decoder_output.shape[0]
    lens = lens.astype(jnp.int32)

    cap = _vmem_capacity_bytes()                       # 64 MiB v7x, 128 MiB v5e/v6e
    vmem_budget = int(min(cap // 2, 64 * 1024 * 1024))
    b_tile = _choose_batch_tile(B, S_dec, S_enc, H, vmem_budget)
    num_tiles = pl.cdiv(B, b_tile)

    grid_spec = pltpu.PrefetchScalarGridSpec(
        num_scalar_prefetch=1,                         # lens -> SMEM
        grid=(num_tiles,),
        in_specs=[
            # Seq-first tiles read directly from HBM (strided batch-slab DMA);
            # no wrapper transpose and no in-kernel swapaxes relayout.
            pl.BlockSpec((S_dec, b_tile, H), lambda t, lens_smem: (0, t, 0)),
            pl.BlockSpec((S_enc, b_tile, H), lambda t, lens_smem: (0, t, 0)),
        ],
        out_specs=(
            pl.BlockSpec((b_tile, S_dec, H), lambda t, lens_smem: (t, 0, 0)),
            pl.BlockSpec((b_tile, S_dec, S_enc), lambda t, lens_smem: (t, 0, 0)),
        ),
    )

    context, weights = pl.pallas_call(
        _attention_kernel,
        grid_spec=grid_spec,
        out_shape=(
            jax.ShapeDtypeStruct((B, S_dec, H), jnp.float32),
            jax.ShapeDtypeStruct((B, S_dec, S_enc), jnp.float32),
        ),
        compiler_params=pltpu.CompilerParams(
            # Independent batch tiles -> shardable across v7x's 2 TensorCores.
            dimension_semantics=("parallel",),
            # Same budget the tile size was derived from (incl. temporaries).
            vmem_limit_bytes=vmem_budget,
        ),
    )(lens, decoder_output, encoder_outputs)

    return context, weights


def _reference_forward(encoder_outputs, decoder_output, lens):
    """Pure-JAX f32 reference mirroring the PyTorch code (for verification)."""
    dec_b = jnp.transpose(decoder_output, (1, 0, 2))
    enc_b = jnp.transpose(encoder_outputs, (1, 0, 2))
    scores = jnp.einsum("bqh,bkh->bqk", dec_b, enc_b,
                        precision=lax.Precision.HIGHEST)
    S_enc = encoder_outputs.shape[0]
    mask = jnp.arange(S_enc)[None, :] < lens[:, None]
    scores = jnp.where(mask[:, None, :], scores, -jnp.inf)
    weights = jax.nn.softmax(scores, axis=2)
    context = jnp.einsum("bqk,bkh->bqh", weights, enc_b,
                         precision=lax.Precision.HIGHEST)
    return context, weights


if __name__ == "__main__":
    key = jax.random.PRNGKey(0)
    k_enc, k_dec, k_w, k_b, k_enc2, k_dec2, k_len2 = jax.random.split(key, 7)

    # W_a = nn.Linear(400, 400): defined by the module but never used in forward().
    W_a_weight = jax.random.normal(k_w, (400, 400), dtype=jnp.float32) * 0.05
    W_a_bias = jax.random.normal(k_b, (400,), dtype=jnp.float32) * 0.05
    # TODO(synk): W_a is initialized in __init__ but never applied in forward(); kept for parity only.

    # Tolerances: the only intentional deviation from the f32 PyTorch math is the
    # bf16-operand value matmul (~2e-3 relative on context); weights are computed
    # fully in f32 (~1e-6 expected).  The margin below additionally covers
    # platform numeric differences (EUP exp, MXU f32 emulation) while still
    # catching any structural bug (masking / layout errors are O(1)).
    ATOL = RTOL = 2e-2

    # --- Case 1: tiny shapes (single batch tile). ---
    B, S_enc, S_dec, H = 2, 16, 8, 32
    enc = jax.random.normal(k_enc, (S_enc, B, H), dtype=jnp.float32)
    dec = jax.random.normal(k_dec, (S_dec, B, H), dtype=jnp.float32)
    lens = jnp.array([S_enc, 9], dtype=jnp.int32)

    ctx, w = attention_forward(enc, dec, lens)
    jax.block_until_ready((ctx, w))
    ref_ctx, ref_w = _reference_forward(enc, dec, lens)
    assert jnp.allclose(w, ref_w, atol=ATOL, rtol=RTOL)
    assert jnp.allclose(ctx, ref_ctx, atol=ATOL, rtol=RTOL)

    # --- Case 2: multi-tile grid with a ragged last tile and varied lens. ---
    B2, S_enc2, S_dec2, H2 = 20, 24, 8, 128
    enc2 = jax.random.normal(k_enc2, (S_enc2, B2, H2), dtype=jnp.float32)
    dec2 = jax.random.normal(k_dec2, (S_dec2, B2, H2), dtype=jnp.float32)
    lens2 = jax.random.randint(k_len2, (B2,), 1, S_enc2 + 1).astype(jnp.int32)

    ctx2, w2 = attention_forward(enc2, dec2, lens2)
    jax.block_until_ready((ctx2, w2))
    ref_ctx2, ref_w2 = _reference_forward(enc2, dec2, lens2)
    assert jnp.allclose(w2, ref_w2, atol=ATOL, rtol=RTOL)
    assert jnp.allclose(ctx2, ref_ctx2, atol=ATOL, rtol=RTOL)

    print("KERNEL_OK")
</pallas_src>

<mosaic_0001>
module attributes {stable_mosaic.version = 11 : i64} {
  func.func @_attention_kernel(%arg0: i32, %arg1: memref<2xi32, #tpu.memory_space<smem>>, %arg2: memref<8x2x32xf32, #tpu.memory_space<vmem>>, %arg3: memref<16x2x32xf32, #tpu.memory_space<vmem>>, %arg4: memref<2x8x32xf32, #tpu.memory_space<vmem>>, %arg5: memref<2x8x16xf32, #tpu.memory_space<vmem>>) attributes {dimension_semantics = [#tpu.dimension_semantics<parallel>], iteration_bounds = array<i64: 1>, scalar_prefetch = 1 : i64, scratch_operands = 0 : i64, tpu.core_type = #tpu.core_type<tc>, window_params = [{transform_indices = @transform_0, window_bounds = array<i64: 8, 2, 32>}, {transform_indices = @transform_1, window_bounds = array<i64: 16, 2, 32>}, {transform_indices = @transform_2, window_bounds = array<i64: 2, 8, 32>}, {transform_indices = @transform_3, window_bounds = array<i64: 2, 8, 16>}]} {
    %c2_i32 = arith.constant 2 : i32
    %0 = arith.muli %arg0, %c2_i32 : i32
    %1 = tpu.iota {dimensions = array<i32: 1>} : vector<8x16xi32>
    %c0_i32 = arith.constant 0 : i32
    %2 = arith.addi %0, %c0_i32 : i32
    %c1_i32 = arith.constant 1 : i32
    %3 = arith.minsi %2, %c1_i32 : i32
    %4 = arith.index_cast %3 : i32 to index
    %5 = memref.load %arg1[%4] : memref<2xi32, #tpu.memory_space<smem>>
    %c0 = arith.constant 0 : index
    %c0_0 = arith.constant 0 : index
    %c0_1 = arith.constant 0 : index
    %6 = vector.load %arg2[%c0, %c0_0, %c0_1] : memref<8x2x32xf32, #tpu.memory_space<vmem>>, vector<8x1x32xf32>
    %7 = vector.shape_cast %6 : vector<8x1x32xf32> to vector<8x32xf32>
    %c0_2 = arith.constant 0 : index
    %c0_3 = arith.constant 0 : index
    %c0_4 = arith.constant 0 : index
    %8 = vector.load %arg3[%c0_2, %c0_3, %c0_4] : memref<16x2x32xf32, #tpu.memory_space<vmem>>, vector<16x1x32xf32>
    %9 = vector.shape_cast %8 : vector<16x1x32xf32> to vector<16x32xf32>
    %cst = arith.constant dense<0.000000e+00> : vector<8x16xf32>
    %10 = tpu.matmul %7, %9, %cst {dimension_numbers = #tpu.dot_dimension_numbers<[1], [1], [0], [0], [0, 0, 1, 0], [], []>} : vector<8x32xf32>, vector<16x32xf32>, vector<8x16xf32> -> vector<8x16xf32>
    %11 = vector.broadcast %5 : i32 to vector<8x16xi32>
    %12 = arith.cmpi slt, %1, %11 : vector<8x16xi32>
    %cst_5 = arith.constant 0xFF800000 : f32
    %13 = vector.broadcast %cst_5 : f32 to vector<8x16xf32>
    %14 = arith.select %12, %10, %13 : vector<8x16xi1>, vector<8x16xf32>
    %cst_6 = arith.constant dense<0xFF800000> : vector<8xf32>
    %15 = vector.multi_reduction <maximumf>, %14, %cst_6 [1] : vector<8x16xf32> to vector<8xf32>
    %16 = vector.shape_cast %15 : vector<8xf32> to vector<8x1xf32>
    %17 = vector.broadcast %16 : vector<8x1xf32> to vector<8x16xf32>
    %18 = arith.subf %14, %17 : vector<8x16xf32>
    %19 = math.exp %18 : vector<8x16xf32>
    %cst_7 = arith.constant dense<0.000000e+00> : vector<8xf32>
    %20 = vector.multi_reduction <add>, %19, %cst_7 [1] : vector<8x16xf32> to vector<8xf32>
    %21 = vector.shape_cast %20 : vector<8xf32> to vector<8x1xf32>
    %22 = vector.broadcast %21 : vector<8x1xf32> to vector<8x16xf32>
    %23 = arith.divf %19, %22 : vector<8x16xf32>
    %c0_8 = arith.constant 0 : index
    %c0_9 = arith.constant 0 : index
    %c0_10 = arith.constant 0 : index
    %24 = vector.load %arg5[%c0_8, %c0_9, %c0_10] : memref<2x8x16xf32, #tpu.memory_space<vmem>>, vector<1x8x16xf32>
    %25 = vector.shape_cast %24 : vector<1x8x16xf32> to vector<8x16xf32>
    %26 = vector.shape_cast %23 : vector<8x16xf32> to vector<1x8x16xf32>
    tpu.vector_store %arg5[%c0_8, %c0_9, %c0_10], %26 {strides = array<i32>} : memref<2x8x16xf32, #tpu.memory_space<vmem>>, vector<1x8x16xf32>,
    %27 = arith.truncf %23 : vector<8x16xf32> to vector<8x16xbf16>
    %28 = arith.truncf %9 : vector<16x32xf32> to vector<16x32xbf16>
    %cst_11 = arith.constant dense<0.000000e+00> : vector<8x32xf32>
    %29 = tpu.matmul %27, %28, %cst_11 {dimension_numbers = #tpu.dot_dimension_numbers<[1], [0], [0], [1], [0, 0, 1, 1], [], []>} : vector<8x16xbf16>, vector<16x32xbf16>, vector<8x32xf32> -> vector<8x32xf32>
    %c0_12 = arith.constant 0 : index
    %c0_13 = arith.constant 0 : index
    %c0_14 = arith.constant 0 : index
    %30 = vector.load %arg4[%c0_12, %c0_13, %c0_14] : memref<2x8x32xf32, #tpu.memory_space<vmem>>, vector<1x8x32xf32>
    %31 = vector.shape_cast %30 : vector<1x8x32xf32> to vector<8x32xf32>
    %32 = vector.shape_cast %29 : vector<8x32xf32> to vector<1x8x32xf32>
    tpu.vector_store %arg4[%c0_12, %c0_13, %c0_14], %32 {strides = array<i32>} : memref<2x8x32xf32, #tpu.memory_space<vmem>>, vector<1x8x32xf32>,
    %c1_i32_15 = arith.constant 1 : i32
    %33 = arith.addi %0, %c1_i32_15 : i32
    %c1_i32_16 = arith.constant 1 : i32
    %34 = arith.minsi %33, %c1_i32_16 : i32
    %35 = arith.index_cast %34 : i32 to index
    %36 = memref.load %arg1[%35] : memref<2xi32, #tpu.memory_space<smem>>
    %c0_17 = arith.constant 0 : index
    %c1 = arith.constant 1 : index
    %c0_18 = arith.constant 0 : index
    %37 = vector.load %arg2[%c0_17, %c1, %c0_18] : memref<8x2x32xf32, #tpu.memory_space<vmem>>, vector<8x1x32xf32>
    %38 = vector.shape_cast %37 : vector<8x1x32xf32> to vector<8x32xf32>
    %c0_19 = arith.constant 0 : index
    %c1_20 = arith.constant 1 : index
    %c0_21 = arith.constant 0 : index
    %39 = vector.load %arg3[%c0_19, %c1_20, %c0_21] : memref<16x2x32xf32, #tpu.memory_space<vmem>>, vector<16x1x32xf32>
    %40 = vector.shape_cast %39 : vector<16x1x32xf32> to vector<16x32xf32>
    %cst_22 = arith.constant dense<0.000000e+00> : vector<8x16xf32>
    %41 = tpu.matmul %38, %40, %cst_22 {dimension_numbers = #tpu.dot_dimension_numbers<[1], [1], [0], [0], [0, 0, 1, 0], [], []>} : vector<8x32xf32>, vector<16x32xf32>, vector<8x16xf32> -> vector<8x16xf32>
    %42 = vector.broadcast %36 : i32 to vector<8x16xi32>
    %43 = arith.cmpi slt, %1, %42 : vector<8x16xi32>
    %cst_23 = arith.constant 0xFF800000 : f32
    %44 = vector.broadcast %cst_23 : f32 to vector<8x16xf32>
    %45 = arith.select %43, %41, %44 : vector<8x16xi1>, vector<8x16xf32>
    %cst_24 = arith.constant dense<0xFF800000> : vector<8xf32>
    %46 = vector.multi_reduction <maximumf>, %45, %cst_24 [1] : vector<8x16xf32> to vector<8xf32>
    %47 = vector.shape_cast %46 : vector<8xf32> to vector<8x1xf32>
    %48 = vector.broadcast %47 : vector<8x1xf32> to vector<8x16xf32>
    %49 = arith.subf %45, %48 : vector<8x16xf32>
    %50 = math.exp %49 : vector<8x16xf32>
    %cst_25 = arith.constant dense<0.000000e+00> : vector<8xf32>
    %51 = vector.multi_reduction <add>, %50, %cst_25 [1] : vector<8x16xf32> to vector<8xf32>
    %52 = vector.shape_cast %51 : vector<8xf32> to vector<8x1xf32>
    %53 = vector.broadcast %52 : vector<8x1xf32> to vector<8x16xf32>
    %54 = arith.divf %50, %53 : vector<8x16xf32>
    %c1_26 = arith.constant 1 : index
    %c0_27 = arith.constant 0 : index
    %c0_28 = arith.constant 0 : index
    %55 = vector.load %arg5[%c1_26, %c0_27, %c0_28] : memref<2x8x16xf32, #tpu.memory_space<vmem>>, vector<1x8x16xf32>
    %56 = vector.shape_cast %55 : vector<1x8x16xf32> to vector<8x16xf32>
    %57 = vector.shape_cast %54 : vector<8x16xf32> to vector<1x8x16xf32>
    tpu.vector_store %arg5[%c1_26, %c0_27, %c0_28], %57 {strides = array<i32>} : memref<2x8x16xf32, #tpu.memory_space<vmem>>, vector<1x8x16xf32>,
    %58 = arith.truncf %54 : vector<8x16xf32> to vector<8x16xbf16>
    %59 = arith.truncf %40 : vector<16x32xf32> to vector<16x32xbf16>
    %cst_29 = arith.constant dense<0.000000e+00> : vector<8x32xf32>
    %60 = tpu.matmul %58, %59, %cst_29 {dimension_numbers = #tpu.dot_dimension_numbers<[1], [0], [0], [1], [0, 0, 1, 1], [], []>} : vector<8x16xbf16>, vector<16x32xbf16>, vector<8x32xf32> -> vector<8x32xf32>
    %c1_30 = arith.constant 1 : index
    %c0_31 = arith.constant 0 : index
    %c0_32 = arith.constant 0 : index
    %61 = vector.load %arg4[%c1_30, %c0_31, %c0_32] : memref<2x8x32xf32, #tpu.memory_space<vmem>>, vector<1x8x32xf32>
    %62 = vector.shape_cast %61 : vector<1x8x32xf32> to vector<8x32xf32>
    %63 = vector.shape_cast %60 : vector<8x32xf32> to vector<1x8x32xf32>
    tpu.vector_store %arg4[%c1_30, %c0_31, %c0_32], %63 {strides = array<i32>} : memref<2x8x32xf32, #tpu.memory_space<vmem>>, vector<1x8x32xf32>,
    return
  }
  func.func @transform_0(%arg0: i32, %arg1: memref<2xi32, #tpu.memory_space<smem>>) -> (i32, i32, i32) {
    %c0_i32 = arith.constant 0 : i32
    %c0_i32_0 = arith.constant 0 : i32
    %c0_i32_1 = arith.constant 0 : i32
    return %c0_i32, %arg0, %c0_i32_0 : i32, i32, i32
  }
  func.func @transform_1(%arg0: i32, %arg1: memref<2xi32, #tpu.memory_space<smem>>) -> (i32, i32, i32) {
    %c0_i32 = arith.constant 0 : i32
    %c0_i32_0 = arith.constant 0 : i32
    %c0_i32_1 = arith.constant 0 : i32
    return %c0_i32, %arg0, %c0_i32_0 : i32, i32, i32
  }
  func.func @transform_2(%arg0: i32, %arg1: memref<2xi32, #tpu.memory_space<smem>>) -> (i32, i32, i32) {
    %c0_i32 = arith.constant 0 : i32
    %c0_i32_0 = arith.constant 0 : i32
    %c0_i32_1 = arith.constant 0 : i32
    return %arg0, %c0_i32, %c0_i32_0 : i32, i32, i32
  }
  func.func @transform_3(%arg0: i32, %arg1: memref<2xi32, #tpu.memory_space<smem>>) -> (i32, i32, i32) {
    %c0_i32 = arith.constant 0 : i32
    %c0_i32_0 = arith.constant 0 : i32
    %c0_i32_1 = arith.constant 0 : i32
    return %arg0, %c0_i32, %c0_i32_0 : i32, i32, i32
  }
}

</mosaic_0001>

<bundles_post_ra>
// kernel: tpu_custom_call.1
= control target key start
LH: loop header
LB: loop body
LE: loop exit
PB: predicated region body
PF: predicated region fallthrough
CT: control target
= control target key end

     0   :  { %s874_s15 = smov [#allocation3]   ;;  %s1197_s0 = inlined_call_operand.hbm [shape: s32[2], index: 0, kind: input, shape index: {}]   ;;  %s1198_s1 = inlined_call_operand.hbm [shape: f32[8,2,32], index: 1, kind: input, shape index: {}]   ;;  %s1199_s2 = inlined_call_operand.hbm [shape: f32[16,2,32], index: 2, kind: input, shape index: {}]   ;;  %s1200_s3 = inlined_call_operand.hbm [shape: f32[2,8,32], index: 3, kind: output, shape index: {0}]   ;;  %s1201_s4 = inlined_call_operand.hbm [shape: f32[2,8,16], index: 4, kind: output, shape index: {1}]  }
   0x1   :  { %11 = dma.hbm_to_smem %s1197_s0, 16, %s874_s15, [#allocation2] }
   0x2   :  { %864 = dma.done.wait [#allocation2], 16 }
   0x3   :  { %865 = vsyncadd [#allocation2], 4294967280 }
   0x4   :  { %13 = sfence }
   0x5   :  { %14 = vsyncpa [#allocation5], 0 }
   0x6   :  { %15 = vsyncpa [#allocation8], 0 }
   0x7   :  { %16 = vsyncpa [#allocation6], 0 }
   0x8   :  { %17 = vsyncpa [#allocation11], 0  ;;  %s875_s18 = smov [#allocation4]  }
   0x9   :  { %s23_s19 = sshll.u32 %s875_s18, 4  ;;  %s24_s19 = int_to_ptr.vmem [resolvable:$true] %s23_s19 }
   0xa   :  { %s792_s20 = scalar_lea.vmem %s24_s19, 256  ;;  %p797_p1 = scmp.lt.s32.totalorder %s24_s19, %s24_s19 }
   0xb   :  { %p793_p0 = scmp.ne.s32.totalorder %s24_s19, %s792_s20  ;;  %p798_p2 = scmp.lt.s32.totalorder %s792_s20, %s792_s20 }
   0xd   :  { %p799_p3 = por %p798_p2, %p797_p1 }
   0xf   :  { %p800_p4 = pnand %p799_p3, %p793_p0 }
  0x11   :  { %803 = shalt.err (!%p800_p4)
}
  0x12   :  { %s876_s21 = smov 32   ;;  %s877_s22 = smov 2  }
  0x13   :  { %29 = dma.hbm_to_vmem [thread:$0]  %s1198_s1, 256, %s24_s19, [#allocation5], %s876_s21, %s876_s21, %s877_s22  }
  0x14   :  { %s878_s24 = smov [#allocation7]  }
  0x15   :  { %s35_s25 = sshll.u32 %s878_s24, 4  ;;  %s36_s25 = int_to_ptr.vmem [resolvable:$true] %s35_s25 }
  0x16   :  { %s812_s26 = scalar_lea.vmem %s36_s25, 512  ;;  %p817_p6 = scmp.lt.s32.totalorder %s36_s25, %s36_s25 }
  0x17   :  { %p813_p5 = scmp.ne.s32.totalorder %s36_s25, %s812_s26  ;;  %p818_p7 = scmp.lt.s32.totalorder %s812_s26, %s812_s26 }
  0x19   :  { %p819_p8 = por %p818_p7, %p817_p6 }
  0x1b   :  { %p820_p9 = pnand %p819_p8, %p813_p5 }
  0x1d   :  { %823 = shalt.err (!%p820_p9)
}
  0x1e   :  { %41 = dma.hbm_to_vmem [thread:$0]  %s1199_s2, 512, %s36_s25, [#allocation8], %s876_s21, %s876_s21, %s877_s22  }
  0x1f   :  { %866 = dma.done.wait [#allocation5], 256  }
  0x20   :  { %867 = vsyncadd [#allocation5], 4294967040 }
  0x21   :  { %868 = dma.done.wait [#allocation8], 512  }
  0x22   :  { %869 = vsyncadd [#allocation8], 4294966784  ;;  %v879_v0 = vmov 0.0   ;;  %vm880_vm0 = vmmov 0   ;;  %vm88_vm1 = vcmask 1041409   ;;  %vm91_vm2 = vcmask 1042434  }
  0x23   :  { %731 = vmatprep.subr.mxu0 %v879_v0  ;;  %738 = vmatprep.subr.bf16.mxu1 %v879_v0  ;;  %vm94_vm3 = vcmask 1043459   ;;  %vm97_vm4 = vcmask 1044484   ;;  %vm100_vm5 = vcmask 1045509   ;;  %vm103_vm6 = vcmask 1046534   ;;  %v925_v1 = vld [vmem:[#allocation7 + $0x10] sm:$0x1] }
  0x24   :  { %735 = vmatprep.mubr.msk.f32.mxu0 %vm880_vm0, %v879_v0  ;;  %740 = vmatprep.mubr.msk.bf16.mxu1 %vm880_vm0, %v879_v0  ;;  %vm106_vm7 = vcmask 1047559   ;;  %v927_v2 = vld [vmem:[#allocation7 + $0x12] sm:$0x1]  ;;  %v929_v3 = vld [vmem:[#allocation7 + $0x14] sm:$0x1]  ;;  %vm152_vm8 = vcmask 261120  }
  0x25   :  { %v931_v4 = vld [vmem:[#allocation7 + $0x16] sm:$0x1]  ;;  %v933_v5 = vld [vmem:[#allocation7 + $0x18] sm:$0x1]  ;;  %v935_v6 = vld [vmem:[#allocation7 + $0x1a] sm:$0x1] }
  0x26   :  { %v937_v7 = vld [vmem:[#allocation7 + $0x1c] sm:$0x1]  ;;  %v939_v8 = vld [vmem:[#allocation7 + $0x1e] sm:$0x1]  ;;  %v138_v9 = vrot.slane %v927_v2, 7  ;;  %v140_v10 = vrot.slane %v929_v3, 6 }
  0x27   :  { %v142_v11 = vrot.slane %v931_v4, 5  ;;  %v144_v12 = vrot.slane %v933_v5, 4  ;;  %v146_v13 = vrot.slane %v935_v6, 3  ;;  %v946_v14 = vld [vmem:[#allocation7] sm:$0x1]  ;;  %v148_v16 = vrot.slane %v937_v7, 2 }
  0x28   :  { %v139_v15 = vsel %vm88_vm1, %v138_v9, %v925_v1  ;;  %v150_v17 = vrot.slane %v939_v8, 1  ;;  %v952_v18 = vld [vmem:[#allocation7 + $0x2] sm:$0x1]  ;;  %v954_v19 = vld [vmem:[#allocation7 + $0x4] sm:$0x1]  ;;  %s54_s1 = sld [smem:[#allocation3]] }
  0x29   :  { %v141_v20 = vsel %vm91_vm2, %v140_v10, %v139_v15  ;;  %v957_v21 = vld [vmem:[#allocation7 + $0x6] sm:$0x1]  ;;  %v959_v22 = vld [vmem:[#allocation7 + $0x8] sm:$0x1]  ;;  %v961_v23 = vld [vmem:[#allocation7 + $0xa] sm:$0x1] }
  0x2a   :  { %v143_v24 = vsel %vm94_vm3, %v142_v11, %v141_v20  ;;  %v964_v25 = vld [vmem:[#allocation7 + $0xc] sm:$0x1]  ;;  %v966_v26 = vld [vmem:[#allocation7 + $0xe] sm:$0x1]  ;;  %v124_v27 = vrot.slane %v952_v18, 7  ;;  %v126_v28 = vrot.slane %v954_v19, 6 }
  0x2b   :  { %v145_v29 = vsel %vm97_vm4, %v144_v12, %v143_v24  ;;  %v128_v30 = vrot.slane %v957_v21, 5  ;;  %v130_v31 = vrot.slane %v959_v22, 4  ;;  %v132_v32 = vrot.slane %v961_v23, 3  ;;  %v55_v33 = vld [vmem:[#allocation4] sm:$0x1]  ;;  %s716_s2 = sld [smem:[#allocation3 + $0x1]] }
  0x2c   :  { %v147_v34 = vsel %vm100_vm5, %v146_v13, %v145_v29  ;;  %v125_v35 = vsel %vm88_vm1, %v124_v27, %v946_v14  ;;  %v134_v36 = vrot.slane %v964_v25, 2  ;;  %v136_v37 = vrot.slane %v966_v26, 1  ;;  %v56_v38 = vld [vmem:[#allocation4 + $0x2] sm:$0x1]  ;;  %v57_v39 = vld [vmem:[#allocation4 + $0x4] sm:$0x1] }
  0x2d   :  { %v149_v40 = vsel %vm103_vm6, %v148_v16, %v147_v34  ;;  %v127_v41 = vsel %vm91_vm2, %v126_v28, %v125_v35  ;;  %v58_v42 = vld [vmem:[#allocation4 + $0x6] sm:$0x1]  ;;  %v59_v43 = vld [vmem:[#allocation4 + $0x8] sm:$0x1]  ;;  %v60_v44 = vld [vmem:[#allocation4 + $0xa] sm:$0x1]  ;;  %v50_v12 = vlaneseq  ;;  %v248_v34 = vpack.c.bf16 %v954_v19, %v954_v19 }
  0x2e   :  { %v151_v45 = vsel %vm106_vm7, %v150_v17, %v149_v40  ;;  %v129_v46 = vsel %vm94_vm3, %v128_v30, %v127_v41  ;;  %v61_v47 = vld [vmem:[#allocation4 + $0xc] sm:$0x1]  ;;  %v87_v48 = vrot.slane %v56_v38, 7  ;;  %v90_v49 = vrot.slane %v57_v39, 6  ;;  %v62_v51 = vld [vmem:[#allocation4 + $0xe] sm:$0x1] }
  0x2f   :  { %732 = vmatpush3.xpose.msk.msra.mxu0 %vm152_vm8, %v151_v45  ;;  %v131_v50 = vsel %vm97_vm4, %v130_v31, %v129_v46  ;;  %v93_v52 = vrot.slane %v58_v42, 5  ;;  %v96_v53 = vrot.slane %v59_v43, 4  ;;  %v99_v56 = vrot.slane %v60_v44, 3  ;;  %s881_s29 = smov [#allocation10]  }
  0x30   :  { %733 = vmatprep.subr.mxu0 %v879_v0  ;;  %v133_v54 = vsel %vm100_vm5, %v132_v32, %v131_v50  ;;  %v89_v55 = vsel %vm88_vm1, %v87_v48, %v55_v33  ;;  %v102_v59 = vrot.slane %v61_v47, 2  ;;  %v105_v62 = vrot.slane %v62_v51, 1  ;;  %s695_s30 = sshll.u32 %s881_s29, 4  ;;  %s696_s30 = int_to_ptr.vmem [resolvable:$true] %s695_s30 }
  0x31   :  { %v135_v57 = vsel %vm103_vm6, %v134_v36, %v133_v54  ;;  %v92_v58 = vsel %vm91_vm2, %v90_v49, %v89_v55  ;;  %v1001_v13 = vand.u32 127, %v50_v12  ;;  %v229_v15 = vstv %s54_s1  ;;  %s824_s5 = scalar_lea.vmem %s696_s30, 256  ;;  %p829_p11 = scmp.lt.s32.totalorder %s696_s30, %s696_s30 }
  0x32   :  { %v137_v60 = vsel %vm106_vm7, %v136_v37, %v135_v57  ;;  %v95_v61 = vsel %vm94_vm3, %v93_v52, %v92_v58  ;;  %vm232_vm10 = vcmask 130048   ;;  %v254_v32 = vpack.c.bf16 %v925_v1, %v925_v1  ;;  %p825_p10 = scmp.ne.s32.totalorder %s696_s30, %s824_s5  ;;  %p830_p12 = scmp.lt.s32.totalorder %s824_s5, %s824_s5 }
  0x33   :  { %734 = vmatpush3.xpose.msk.msra.mxu0 %vm152_vm8, %v137_v60  ;;  %v98_v63 = vsel %vm97_vm4, %v96_v53, %v95_v61  ;;  %vm230_vm9 = vcmp.lt.s32.totalorder %v1001_v13, %v229_v15  ;;  %v247_v33 = vpack.c.bf16 %v952_v18, %v952_v18  ;;  %v249_v35 = vpack.c.bf16 %v957_v21, %v957_v21 }
  0x34   :  { %v101_v9 = vsel %vm100_vm5, %v99_v56, %v98_v63  ;;  %751 = vmatprep.subr.bf16.mxu0 %v879_v0  ;;  %v250_v36 = vpack.c.bf16 %v959_v22, %v959_v22  ;;  %v246_v37 = vpack.c.bf16 %v946_v14, %v946_v14  ;;  %v251_v38 = vpack.c.bf16 %v961_v23, %v961_v23  ;;  %p831_p13 = por %p830_p12, %p829_p11 }
  0x35   :  { %v104_v10 = vsel %vm103_vm6, %v102_v59, %v101_v9  ;;  %v252_v1 = vpack.c.bf16 %v964_v25, %v964_v25  ;;  %v255_v18 = vpack.c.bf16 %v927_v2, %v927_v2  ;;  %v253_v19 = vpack.c.bf16 %v966_v26, %v966_v26 }
  0x36   :  { %v107_v11 = vsel %vm106_vm7, %v105_v62, %v104_v10  ;;  %v256_v21 = vpack.c.bf16 %v929_v3, %v929_v3  ;;  %v257_v22 = vpack.c.bf16 %v931_v4, %v931_v4  ;;  %v258_v14 = vpack.c.bf16 %v933_v5, %v933_v5  ;;  %p832_p0 = pnand %p831_p13, %p825_p10 }
  0x37   :  { %736 = vmatmul.mubr.msk.f32.vlgmr.msra.gmra.mxu0 %vm152_vm8, %v107_v11  ;;  %v259_v23 = vpack.c.bf16 %v935_v6, %v935_v6  ;;  %v260_v25 = vpack.c.bf16 %v937_v7, %v937_v7  ;;  %v261_v2 = vpack.c.bf16 %v939_v8, %v939_v8  ;;  %v279_v39 = vunpack.c.l.b16 %v247_v33  ;;  %v1058_v33 = vld [vmem:[#allocation7 + $0x15] sm:$0x1] }
  0x38   :  { %753 = vmatprep.mubr.msk.bf16.mxu0 %vm880_vm0, %v879_v0  ;;  %v280_v26 = vunpack.c.l.b16 %v248_v34  ;;  %v281_v40 = vunpack.c.l.b16 %v249_v35  ;;  %v282_v41 = vunpack.c.l.b16 %v250_v36  ;;  %v283_v3 = vunpack.c.l.b16 %v251_v38  ;;  %v1061_v35 = vld [vmem:[#allocation7 + $0x11] sm:$0x1]  ;;  %v1063_v36 = vld [vmem:[#allocation7 + $0x3] sm:$0x1] }
  0x39   :  { %v286_v42 = vunpack.c.l.b16 %v254_v32  ;;  %v278_v43 = vunpack.c.l.b16 %v246_v37  ;;  %v287_v4 = vunpack.c.l.b16 %v255_v18  ;;  %v288_v44 = vunpack.c.l.b16 %v256_v21  ;;  %v1056_v32 = vld [vmem:[#allocation7 + $0x13] sm:$0x1]  ;;  %v1065_v37 = vld [vmem:[#allocation7 + $0x17] sm:$0x1]  ;;  %v1070_v18 = vld [vmem:[#allocation7 + $0x5] sm:$0x1] }
  0x3a   :  { %v284_v45 = vunpack.c.l.b16 %v252_v1  ;;  %v285_v5 = vunpack.c.l.b16 %v253_v19  ;;  %v289_v46 = vunpack.c.l.b16 %v257_v22  ;;  %v290_v47 = vunpack.c.l.b16 %v258_v14  ;;  %v373_v21 = vld [vmem:[#allocation4 + $0x3] sm:$0x1]  ;;  %v1073_v14 = vld [vmem:[#allocation7 + $0x1] sm:$0x1] }
  0x3b   :  { %v291_v6 = vunpack.c.l.b16 %v259_v23  ;;  %v294_v48 = vrot.slane %v279_v39, 7  ;;  %v296_v49 = vrot.slane %v280_v26, 6  ;;  %v298_v7 = vrot.slane %v281_v40, 5  ;;  %v1075_v23 = vld [vmem:[#allocation7 + $0x19] sm:$0x1] }
  0x3c   :  { %v292_v50 = vunpack.c.l.b16 %v260_v25  ;;  %v293_v51 = vunpack.c.l.b16 %v261_v2  ;;  %v300_v8 = vrot.slane %v282_v41, 4  ;;  %v302_v52 = vrot.slane %v283_v3, 3  ;;  %v1079_v39 = vld [vmem:[#allocation7 + $0x7] sm:$0x1]  ;;  %v374_v40 = vld [vmem:[#allocation4 + $0x5] sm:$0x1] }
  0x3d   :  { %v295_v53 = vsel %vm88_vm1, %v294_v48, %v278_v43  ;;  %v308_v54 = vrot.slane %v287_v4, 7  ;;  %v310_v55 = vrot.slane %v288_v44, 6  ;;  %v312_v56 = vrot.slane %v289_v46, 5  ;;  %v1084_v43 = vld [vmem:[#allocation7 + $0x1b] sm:$0x1] }
  0x3e   :  { %v297_v57 = vsel %vm91_vm2, %v296_v49, %v295_v53  ;;  %v304_v58 = vrot.slane %v284_v45, 2  ;;  %v314_v59 = vrot.slane %v290_v47, 4  ;;  %v306_v61 = vrot.slane %v285_v5, 1  ;;  %v1088_v45 = vld [vmem:[#allocation7 + $0x9] sm:$0x1] }
  0x3f   :  { %v299_v60 = vsel %vm94_vm3, %v298_v7, %v297_v57  ;;  %v309_v62 = vsel %vm88_vm1, %v308_v54, %v286_v42  ;;  %v316_v63 = vrot.slane %v291_v6, 3  ;;  %v318_v11 = vrot.slane %v292_v50, 2  ;;  %v372_v42 = vld [vmem:[#allocation4 + $0x1] sm:$0x1]  ;;  %v375_v46 = vld [vmem:[#allocation4 + $0x7] sm:$0x1] }
  0x40   :  { %v301_v9 = vsel %vm97_vm4, %v300_v8, %v299_v60  ;;  %v311_v10 = vsel %vm91_vm2, %v310_v55, %v309_v62  ;;  %v448_v34 = vrot.slane %v1056_v32, 7  ;;  %v450_v38 = vrot.slane %v1058_v33, 6  ;;  %v1093_v49 = vld [vmem:[#allocation7 + $0x1d] sm:$0x1] }
  0x41   :  { %v303_v12 = vsel %vm100_vm5, %v302_v52, %v301_v9  ;;  %v313_v15 = vsel %vm94_vm3, %v312_v56, %v311_v10  ;;  %v434_v19 = vrot.slane %v1063_v36, 7  ;;  %v452_v25 = vrot.slane %v1065_v37, 5  ;;  %v376_v52 = vld [vmem:[#allocation4 + $0x9] sm:$0x1]  ;;  %v1102_v56 = vld [vmem:[#allocation7 + $0x1f] sm:$0x1] }
  0x42   :  { %v449_v1 = vsel %vm88_vm1, %v448_v34, %v1061_v35  ;;  %v436_v26 = vrot.slane %v1070_v18, 6  ;;  %v404_v41 = vrot.slane %v373_v21, 7  ;;  %v454_v4 = vrot.slane %v1075_v23, 4 }
  0x43   :  { %v451_v2 = vsel %vm91_vm2, %v450_v38, %v449_v1  ;;  %v435_v3 = vsel %vm88_vm1, %v434_v19, %v1073_v14  ;;  %v438_v5 = vrot.slane %v1079_v39, 5  ;;  %v406_v47 = vrot.slane %v374_v40, 6  ;;  %v379_v38 = vld [vmem:[#allocation4 + $0xf] sm:$0x1] }
  0x44   :  { %v453_v44 = vsel %vm94_vm3, %v452_v25, %v451_v2  ;;  %v437_v6 = vsel %vm91_vm2, %v436_v26, %v435_v3  ;;  %v405_v48 = vsel %vm88_vm1, %v404_v41, %v372_v42  ;;  %v456_v7 = vrot.slane %v1084_v43, 3 }
  0x45   :  { %v455_v50 = vsel %vm97_vm4, %v454_v4, %v453_v44  ;;  %v440_v8 = vrot.slane %v1088_v45, 4  ;;  %v408_v53 = vrot.slane %v375_v46, 5  ;;  %v439_v54 = vsel %vm94_vm3, %v438_v5, %v437_v6 }
  0x46   :  { %v407_v55 = vsel %vm91_vm2, %v406_v47, %v405_v48  ;;  %v458_v57 = vrot.slane %v1093_v49, 2  ;;  %v410_v62 = vrot.slane %v376_v52, 4  ;;  %v460_v10 = vrot.slane %v1102_v56, 1 }
  0x47   :  { %v409_v9 = vsel %vm94_vm3, %v408_v53, %v407_v55  ;;  %v538_v41 = vstv %s716_s2  ;;  %v557_v52 = vpack.c.bf16 %v1070_v18, %v1070_v18  ;;  %v563_v53 = vpack.c.bf16 %v1061_v35, %v1061_v35 }
  0x48   :  { %vm539_vm11 = vcmp.lt.s32.totalorder %v1001_v13, %v538_v41  ;;  %v556_v13 = vpack.c.bf16 %v1063_v36, %v1063_v36  ;;  %v555_v55 = vpack.c.bf16 %v1073_v14, %v1073_v14  ;;  %v567_v36 = vpack.c.bf16 %v1075_v23, %v1075_v23 }
  0x49   :  { %v569_v18 = vpack.c.bf16 %v1093_v49, %v1093_v49  ;;  %v559_v35 = vpack.c.bf16 %v1088_v45, %v1088_v45  ;;  %v595_v49 = vunpack.c.l.b16 %v563_v53 }
  0xf7   :  { %v225_v16 = vpop.f32.mrf.mxu0 }
  0xf8   :  { %v231_v17 = vsel %vm230_vm9, %v225_v16, -inf  ;;  %v320_v16 = vrot.slane %v293_v51, 1  ;;  %v1097_v51 = vld [vmem:[#allocation7 + $0xb] sm:$0x1] }
  0xf9   :  { %v737_v20 = vpop.f32.mrf.mxu0  ;;  %v233_v24 = vsel %vm232_vm10, %v231_v17, -inf  ;;  %v442_v60 = vrot.slane %v1097_v51, 3  ;;  %v560_v14 = vpack.c.bf16 %v1097_v51, %v1097_v51 }
  0xfa   :  { %234 = vmax.xlane.f32.xlu0 %v233_v24  ;;  %v315_v20 = vsel %vm97_vm4, %v314_v59, %v313_v15  ;;  %v1106_v59 = vld [vmem:[#allocation7 + $0xd] sm:$0x1]  ;;  %v1113_v15 = vld [vmem:[#allocation7 + $0xf] sm:$0x1] }
  0xfb   :  { %v446_v34 = vrot.slane %v1113_v15, 1  ;;  %v561_v23 = vpack.c.bf16 %v1106_v59, %v1106_v59 }
 0x183   :  { %v235_v27 = vpop.xlane.xlu0 %234 }
 0x184   :  { %v236_v28 = vsub.f32 %v231_v17, %v235_v27  ;;  %v305_v17 = vsel %vm103_vm6, %v304_v58, %v303_v12  ;;  %v317_v27 = vsel %vm100_vm5, %v316_v63, %v315_v20  ;;  %v457_v58 = vsel %vm100_vm5, %v456_v7, %v455_v50 }
 0x185   :  { %v307_v24 = vsel %vm106_vm7, %v306_v61, %v305_v17  ;;  %v377_v61 = vld [vmem:[#allocation4 + $0xb] sm:$0x1]  ;;  %v441_v63 = vsel %vm97_vm4, %v440_v8, %v439_v54  ;;  %v459_v12 = vsel %vm103_vm6, %v458_v57, %v457_v58  ;;  %v378_v17 = vld [vmem:[#allocation4 + $0xd] sm:$0x1]  ;;  %v564_v50 = vpack.c.bf16 %v1056_v32, %v1056_v32 }
 0x186   :  { %v237_v29 = vmul.f32 1.442695, %v236_v28  ;;  %v319_v28 = vsel %vm103_vm6, %v318_v11, %v317_v27  ;;  %v412_v20 = vrot.slane %v377_v61, 3  ;;  %v443_v27 = vsel %vm100_vm5, %v442_v60, %v441_v63 }
 0x187   :  { %v414_v1 = vrot.slane %v378_v17, 2  ;;  %v565_v8 = vpack.c.bf16 %v1058_v33, %v1058_v33  ;;  %v566_v54 = vpack.c.bf16 %v1065_v37, %v1065_v37  ;;  %v558_v32 = vpack.c.bf16 %v1079_v39, %v1079_v39 }
 0x188   :  { %768 = vpow2.f32 %v237_v29  ;;  %v321_v29 = vsel %vm106_vm7, %v320_v16, %v319_v28  ;;  %v444_v16 = vrot.slane %v1106_v59, 2  ;;  %v411_v28 = vsel %vm97_vm4, %v410_v62, %v409_v9 }
 0x189   :  { %v413_v21 = vsel %vm100_vm5, %v412_v20, %v411_v28  ;;  %v568_v33 = vpack.c.bf16 %v1084_v43, %v1084_v43  ;;  %v570_v37 = vpack.c.bf16 %v1102_v56, %v1102_v56  ;;  %v596_v57 = vunpack.c.l.b16 %v564_v50 }
 0x18a   :  { %v445_v19 = vsel %vm103_vm6, %v444_v16, %v443_v27  ;;  %v415_v25 = vsel %vm103_vm6, %v414_v1, %v413_v21  ;;  %v588_v39 = vunpack.c.l.b16 %v556_v13  ;;  %v597_v58 = vunpack.c.l.b16 %v565_v8 }
 0x18b   :  { %v562_v43 = vpack.c.bf16 %v1113_v15, %v1113_v15  ;;  %v589_v60 = vunpack.c.l.b16 %v557_v52  ;;  %v598_v61 = vunpack.c.l.b16 %v566_v54  ;;  %v587_v62 = vunpack.c.l.b16 %v555_v55 }
 0x18c   :  { %v590_v45 = vunpack.c.l.b16 %v558_v32  ;;  %v599_v63 = vunpack.c.l.b16 %v567_v36  ;;  %v600_v9 = vunpack.c.l.b16 %v568_v33  ;;  %v601_v56 = vunpack.c.l.b16 %v569_v18 }
 0x18d   :  { %v603_v51 = vrot.slane %v588_v39, 7  ;;  %v617_v16 = vrot.slane %v596_v57, 7  ;;  %v593_v17 = vunpack.c.l.b16 %v561_v23  ;;  %v594_v20 = vunpack.c.l.b16 %v562_v43 }
 0x18e   :  { %v619_v59 = vrot.slane %v597_v58, 6  ;;  %v607_v15 = vrot.slane %v590_v45, 5  ;;  %v623_v1 = vrot.slane %v599_v63, 4 }
 0x18f   :  { %v604_v27 = vsel %vm88_vm1, %v603_v51, %v587_v62  ;;  %v618_v28 = vsel %vm88_vm1, %v617_v16, %v595_v49 }
 0x195   :  { %v1005_v30 = vpop.eup %768 }
 0x196   :  { %v239_v31 = vsel %vm232_vm10, %v1005_v30, 0.0 }
 0x197   :  { %240 = vadd.xlane.f32.xlu0 %v239_v31  ;;  %v322_v31 = vpack.c.b16 %v321_v29, %v307_v24 }
 0x199   :  { %739 = vmatpush3.bf16.msra.mxu1 %v322_v31  ;;  %v461_v31 = vsel %vm106_vm7, %v460_v10, %v459_v12  ;;  %v591_v10 = vunpack.c.l.b16 %v559_v35  ;;  %v592_v12 = vunpack.c.l.b16 %v560_v14 }
 0x19a   :  { %744 = vmatprep.subr.mxu1 %v879_v0 }
 0x19b   :  { %v611_v21 = vrot.slane %v592_v12, 3 }
 0x220   :  { %v241_v22 = vpop.xlane.xlu0 %240 }
 0x221   :  { %770 = vrcp.f32 %v241_v22  ;;  %v447_v22 = vsel %vm106_vm7, %v446_v34, %v445_v19  ;;  %v609_v34 = vrot.slane %v591_v10, 4 }
 0x22e   :  { %v771_v11 = vpop.eup %770 }
 0x22f   :  { %v243_v24 = vmul.f32 %v771_v11, %v1005_v30  ;;  %v416_v30 = vrot.slane %v379_v38, 1  ;;  %v602_v11 = vunpack.c.l.b16 %v570_v37  ;;  %v620_v38 = vsel %vm91_vm2, %v619_v59, %v618_v28 }
 0x231   :  { %v245_v29 = vpack.c.bf16 %v243_v24, %v243_v24  ;;  %244 = vst.msk [vmem:[#allocation10] sm:$0xff] %vm232_vm10, %v243_v24  ;;  %v417_v2 = vsel %vm106_vm7, %v416_v30, %v415_v25  ;;  %v605_v24 = vrot.slane %v589_v60, 6 }
 0x233   :  { %741 = vmatmul.mubr.msk.bf16.vlgmr.msra.gmra.mxu1 %vm232_vm10, %v245_v29  ;;  %v621_v29 = vrot.slane %v598_v61, 5 }
 0x234   :  { %745 = vmatpush3.xpose.msk.msra.mxu1 %vm152_vm8, %v461_v31  ;;  %748 = vmatprep.mubr.msk.f32.mxu1 %vm880_vm0, %v879_v0  ;;  %v606_v31 = vsel %vm91_vm2, %v605_v24, %v604_v27 }
 0x235   :  { %746 = vmatprep.subr.mxu1 %v879_v0  ;;  %v608_v19 = vsel %vm94_vm3, %v607_v15, %v606_v31  ;;  %v622_v30 = vsel %vm94_vm3, %v621_v29, %v620_v38 }
 0x236   :  { %v610_v25 = vsel %vm97_vm4, %v609_v34, %v608_v19 }
 0x237   :  { %v612_v41 = vsel %vm100_vm5, %v611_v21, %v610_v25 }
 0x238   :  { %747 = vmatpush3.xpose.msk.msra.mxu1 %vm152_vm8, %v447_v22  ;;  %v625_v22 = vrot.slane %v600_v9, 3 }
 0x23b   :  { %749 = vmatmul.mubr.msk.f32.vlgmr.msra.gmra.mxu1 %vm152_vm8, %v417_v2  ;;  %v613_v2 = vrot.slane %v593_v17, 2 }
 0x2f3   :  { %v361_v26 = vpop.f32.mrf.mxu1 }
 0x2f4   :  { %367 = vst.msk [vmem:[#allocation9] sm:$0xff] %vm152_vm8, %v361_v26  ;;  %v624_v26 = vsel %vm97_vm4, %v623_v1, %v622_v30 }
 0x2f5   :  { %v742_v40 = vpop.f32.mrf.mxu1 }
 0x2f6   :  { %v627_v40 = vrot.slane %v601_v56, 2 }
 0x2f7   :  { %v364_v3 = vpop.f32.mrf.mxu1 }
 0x2f8   :  { %v615_v3 = vrot.slane %v594_v20, 1 }
 0x2f9   :  { %v743_v42 = vpop.f32.mrf.mxu1 }
 0x2fa   :  { %v626_v42 = vsel %vm100_vm5, %v625_v22, %v624_v26 }
 0x2fb   :  { %v534_v0 = vpop.f32.mrf.mxu1 }
 0x2fc   :  { %v540_v4 = vsel %vm539_vm11, %v534_v0, -inf  ;;  %v629_v0 = vrot.slane %v602_v11, 1 }
 0x2fd   :  { %v750_v44 = vpop.f32.mrf.mxu1  ;;  %v541_v5 = vsel %vm232_vm10, %v540_v4, -inf }
 0x2fe   :  { %542 = vmax.xlane.f32.xlu1 %v541_v5  ;;  %v628_v44 = vsel %vm103_vm6, %v627_v40, %v626_v42 }
 0x387   :  { %v543_v46 = vpop.xlane.xlu1 %542 }
 0x388   :  { %v544_v47 = vsub.f32 %v540_v4, %v543_v46  ;;  %v614_v4 = vsel %vm103_vm6, %v613_v2, %v612_v41  ;;  %v630_v46 = vsel %vm106_vm7, %v629_v0, %v628_v44 }
 0x389   :  { %v616_v5 = vsel %vm106_vm7, %v615_v3, %v614_v4 }
 0x38a   :  { %v545_v6 = vmul.f32 1.442695, %v544_v47  ;;  %v631_v47 = vpack.c.b16 %v630_v46, %v616_v5 }
 0x38c   :  { %772 = vpow2.f32 %v545_v6  ;;  %752 = vmatpush3.bf16.msra.mxu0 %v631_v47 }
 0x399   :  { %v1137_v48 = vpop.eup %772 }
 0x39a   :  { %v547_v7 = vsel %vm232_vm10, %v1137_v48, 0.0 }
 0x39b   :  { %548 = vadd.xlane.f32.xlu1 %v547_v7 }
 0x424   :  { %v549_v6 = vpop.xlane.xlu1 %548 }
 0x425   :  { %774 = vrcp.f32 %v549_v6 }
 0x432   :  { %v775_v7 = vpop.eup %774 }
 0x433   :  { %v551_v50 = vmul.f32 %v775_v7, %v1137_v48 }
 0x435   :  { %553 = vst.msk [vmem:[#allocation10 + $0x8] sm:$0xff] %vm232_vm10, %v551_v50  ;;  %v554_v13 = vpack.c.bf16 %v551_v50, %v551_v50 }
 0x437   :  { %754 = vmatmul.mubr.msk.bf16.vlgmr.msra.gmra.mxu0 %vm232_vm10, %v554_v13 }
 0x438   :  { %835 = shalt.err (!%p832_p0)
}
 0x439   :  { %s882_s6 = smov 128   ;;  %s883_s7 = smov 8  }
 0x43a   :  { %701 = dma.vmem_to_hbm [thread:$0]  %s696_s30, 256, %s1201_s4, [#allocation11], %s882_s6, %s882_s6, %s883_s7  }
 0x43b   :  { %s884_s10 = smov [#allocation9]  }
 0x43c   :  { %s683_s11 = sshll.u32 %s884_s10, 4  ;;  %s684_s11 = int_to_ptr.vmem [resolvable:$true] %s683_s11 }
 0x43d   :  { %s844_s12 = scalar_lea.vmem %s684_s11, 256  ;;  %p849_p2 = scmp.lt.s32.totalorder %s684_s11, %s684_s11 }
 0x43e   :  { %p845_p1 = scmp.ne.s32.totalorder %s684_s11, %s844_s12  ;;  %p850_p3 = scmp.lt.s32.totalorder %s844_s12, %s844_s12 }
 0x440   :  { %p851_p4 = por %p850_p3, %p849_p2 }
 0x442   :  { %p852_p5 = pnand %p851_p4, %p845_p1 }
 0x4f7   :  { %v670_v48 = vpop.f32.mrf.mxu0 }
 0x4f8   :  { %677 = vst.msk [vmem:[#allocation9 + $0x8] sm:$0xff] %vm152_vm8, %v670_v48 }
 0x4f9   :  { %v755_v8 = vpop.f32.mrf.mxu0 }
 0x4fa   :  { %855 = shalt.err (!%p852_p5)
}
 0x4fb   :  { %689 = dma.vmem_to_hbm [thread:$0]  %s684_s11, 256, %s1200_s3, [#allocation6], %s882_s6, %s882_s6, %s883_s7   ;;  %v673_v52 = vpop.f32.mrf.mxu0 }
 0x4fd   :  { %v756_v53 = vpop.f32.mrf.mxu0 }
 0x4fe   :  { %870 = dma.done.wait [#allocation6], 256  }
 0x4ff   :  { %871 = vsyncadd [#allocation6], 4294967040 }
 0x500   :  { %872 = dma.done.wait [#allocation11], 256  }
 0x501   :  { %873 = vsyncadd [#allocation11], 4294967040 }
 0x502   :  { %708 = vsyncpa [#allocation5], 1 }
 0x503   :  { %709 = vsyncpa [#allocation8], 1 }
 0x504   :  { %710 = vsyncpa [#allocation6], 1 }
 0x505   :  { %711 = vsyncpa [#allocation11], 1 }

</bundles_post_ra>
